<compile_context>
chip_gen: v5e
topology: v5e:2x2
jax: 0.10.0
libtpu: 0.0.40
codegen_flags: <defaults>
</compile_context>

<pallas_src>
import jax
import jax.numpy as jnp
from jax.experimental import pallas as pl
from jax.experimental.pallas import tpu as pltpu

NEG_INF = -1e30  # fill for padded logit lanes (exp underflows to 0 in f32)


def _round_up(x, m):
    return ((x + m - 1) // m) * m


def reinforce_kernel(x_ref,
                     w1_ref, b1_ref,
                     w2_ref, b2_ref,
                     w3_ref, b3_ref,
                     w4_ref, b4_ref,
                     o_ref):
    # Layer 1: bf16 MXU operands, f32 accumulate, f32 bias/relu.
    h = jnp.dot(x_ref[...], w1_ref[...], preferred_element_type=jnp.float32)
    h = jnp.maximum(h + b1_ref[...], 0.0)
    # Layer 2
    h = jnp.dot(h.astype(jnp.bfloat16), w2_ref[...],
                preferred_element_type=jnp.float32)
    h = jnp.maximum(h + b2_ref[...], 0.0)
    # Layer 3
    h = jnp.dot(h.astype(jnp.bfloat16), w3_ref[...],
                preferred_element_type=jnp.float32)
    h = jnp.maximum(h + b3_ref[...], 0.0)
    # Layer 4 + softmax over the (128-padded) feature axis, all in f32.
    logits = jnp.dot(h.astype(jnp.bfloat16), w4_ref[...],
                     preferred_element_type=jnp.float32) + b4_ref[...]
    m = jnp.max(logits, axis=1, keepdims=True)
    e = jnp.exp(logits - m)
    denom = jnp.sum(e, axis=1, keepdims=True)
    probs = e / denom  # exact normalization (kernel is MXU-bound: free)
    # Store only the real nA columns.  Padded lanes carry exactly-0
    # probability, so this is lossless and cuts HBM writeback by nAp/nA.
    o_ref[...] = probs[:, : o_ref.shape[1]].astype(o_ref.dtype)


def prepare_kernel_params(params):
    """Pad hidden/output widths to multiples of 128 (lane-dense vregs) and
    cast the MXU operands (weights) to bf16.  Biases stay f32; padded output
    bias lanes get NEG_INF so the softmax ignores them exactly."""
    nS, H = params["w1"].shape
    nA = params["w4"].shape[1]
    Hp = _round_up(H, 128)
    nAp = _round_up(nA, 128)

    def pad_w(w, rows, cols):
        out = jnp.zeros((rows, cols), jnp.float32)
        out = out.at[: w.shape[0], : w.shape[1]].set(w)
        return out.astype(jnp.bfloat16)

    def pad_b(b, cols, fill=0.0):
        out = jnp.full((1, cols), fill, jnp.float32)
        out = out.at[:, : b.shape[1]].set(b)
        return out

    kparams = {
        "w1": pad_w(params["w1"], nS, Hp), "b1": pad_b(params["b1"], Hp),
        "w2": pad_w(params["w2"], Hp, Hp), "b2": pad_b(params["b2"], Hp),
        "w3": pad_w(params["w3"], Hp, Hp), "b3": pad_b(params["b3"], Hp),
        "w4": pad_w(params["w4"], Hp, nAp), "b4": pad_b(params["b4"], nAp, NEG_INF),
    }
    return kparams, nA, nAp


def _choose_tiling(B, max_tile=2048, min_split_rows=1024):
    """Pick (tile_b, n_steps) such that:
       - tiny batches run as a single step (launch-latency dominated anyway),
       - larger batches get an EVEN step count >= 2 (v7x: both TensorCores
         get balanced work; harmless extra ~0.35 us/step on v5e/v6e),
       - tile_b <= max_tile (amortizes per-step overhead while staying well
         inside the scoped VMEM default on every generation),
       - batch padding is bounded by ~8 rows per step, not a whole tile."""
    B8 = _round_up(max(B, 1), 8)
    if B8 <= min(min_split_rows, max_tile):
        return B8, 1
    n = -(-B8 // max_tile)          # ceil-div
    n = max(n, 2)
    if n % 2:                       # even step count for 2-TC balance
        n += 1
    tile_b = _round_up(-(-B8 // n), 8)
    return tile_b, n


def reinforce_forward(x, params, *, max_tile_b=2048):
    """x: [B, nS] float32; params: dict of (in,out) weights and (1,out) biases.
    max_tile_b can be swept (2048-4096); 2048 keeps the per-step VMEM
    footprint comfortably inside even v5e's 16 MiB scoped default."""
    B, nS = x.shape
    kparams, nA, _ = prepare_kernel_params(params)

    tile_b, n_steps = _choose_tiling(B, max_tile=max_tile_b)
    Bp = tile_b * n_steps

    xp = x.astype(jnp.bfloat16)
    if Bp != B:
        xp = jnp.pad(xp, ((0, Bp - B), (0, 0)))

    def resident(arr):
        # Full array, constant block index -> stays VMEM-resident across steps.
        return pl.BlockSpec(arr.shape, lambda i: (0, 0))

    in_specs = [
        pl.BlockSpec((tile_b, nS), lambda i: (i, 0)),
        resident(kparams["w1"]), resident(kparams["b1"]),
        resident(kparams["w2"]), resident(kparams["b2"]),
        resident(kparams["w3"]), resident(kparams["b3"]),
        resident(kparams["w4"]), resident(kparams["b4"]),
    ]
    # Output block last dim == full array last dim (nA), which is legal even
    # for nA < 128; this removes the padded-f32 writeback + wrapper lane slice.
    out_spec = pl.BlockSpec((tile_b, nA), lambda i: (i, 0))

    out = pl.pallas_call(
        reinforce_kernel,
        out_shape=jax.ShapeDtypeStruct((Bp, nA), jnp.float32),
        grid=(n_steps,),
        in_specs=in_specs,
        out_specs=out_spec,
        compiler_params=pltpu.CompilerParams(
            dimension_semantics=("parallel",),  # megacore sharding on v7x
        ),
    )(xp,
      kparams["w1"], kparams["b1"],
      kparams["w2"], kparams["b2"],
      kparams["w3"], kparams["b3"],
      kparams["w4"], kparams["b4"])

    return out if Bp == B else out[:B]


def init_params(key, nS, nA):
    """Deterministic init mimicking PyTorch nn.Linear default
    (U[-1/sqrt(in), 1/sqrt(in)]).  Weights stored as (in, out)."""
    dims = [(nS, nS * 2), (nS * 2, nS * 2), (nS * 2, nS * 2), (nS * 2, nA)]
    params = {}
    keys = jax.random.split(key, 2 * len(dims))
    for i, (fan_in, fan_out) in enumerate(dims):
        bound = 1.0 / (fan_in ** 0.5)
        w = jax.random.uniform(keys[2 * i], (fan_in, fan_out),
                               minval=-bound, maxval=bound, dtype=jnp.float32)
        b = jax.random.uniform(keys[2 * i + 1], (1, fan_out),
                               minval=-bound, maxval=bound, dtype=jnp.float32)
        params[f"w{i + 1}"] = w
        params[f"b{i + 1}"] = b
    return params


def reference_forward(x, params):
    h = jax.nn.relu(x @ params["w1"] + params["b1"])
    h = jax.nn.relu(h @ params["w2"] + params["b2"])
    h = jax.nn.relu(h @ params["w3"] + params["b3"])
    return jax.nn.softmax(h @ params["w4"] + params["b4"], axis=1)


if __name__ == "__main__":
    nS, nA = 16, 4
    key = jax.random.PRNGKey(0)
    kx, kp, kx2 = jax.random.split(key, 3)
    params = init_params(kp, nS, nA)

    # Small-batch path (single grid step).
    B = 8
    x = jax.random.normal(kx, (B, nS), dtype=jnp.float32)
    out = jax.block_until_ready(reinforce_forward(x, params))
    ref = reference_forward(x, params)
    assert out.shape == (B, nA)
    # bf16 MXU operands => loosened tolerance vs the pure-f32 reference.
    err = float(jnp.max(jnp.abs(out - ref)))
    assert jnp.allclose(out, ref, atol=3e-2, rtol=3e-2), err
    # exact normalization: rows sum to 1 within f32 rounding
    assert jnp.allclose(jnp.sum(out, axis=1), jnp.ones((B,)), atol=1e-4)

    # Larger batch: exercises the adaptive even multi-step grid + row padding.
    B2 = 1048  # -> 2 grid steps of 528 rows, 8 padded rows total
    x2 = jax.random.normal(kx2, (B2, nS), dtype=jnp.float32)
    out2 = jax.block_until_ready(reinforce_forward(x2, params))
    ref2 = reference_forward(x2, params)
    assert out2.shape == (B2, nA)
    err2 = float(jnp.max(jnp.abs(out2 - ref2)))
    assert jnp.allclose(out2, ref2, atol=3e-2, rtol=3e-2), err2
    assert jnp.allclose(jnp.sum(out2, axis=1), jnp.ones((B2,)), atol=1e-4)

    print("KERNEL_OK")
</pallas_src>

<mosaic_0001>
module attributes {stable_mosaic.version = 11 : i64} {
  func.func @reinforce_kernel(%arg0: i32, %arg1: memref<8x16xbf16, #tpu.memory_space<vmem>>, %arg2: memref<16x128xbf16, #tpu.memory_space<vmem>>, %arg3: memref<1x128xf32, #tpu.memory_space<vmem>>, %arg4: memref<128x128xbf16, #tpu.memory_space<vmem>>, %arg5: memref<1x128xf32, #tpu.memory_space<vmem>>, %arg6: memref<128x128xbf16, #tpu.memory_space<vmem>>, %arg7: memref<1x128xf32, #tpu.memory_space<vmem>>, %arg8: memref<128x128xbf16, #tpu.memory_space<vmem>>, %arg9: memref<1x128xf32, #tpu.memory_space<vmem>>, %arg10: memref<8x4xf32, #tpu.memory_space<vmem>>) attributes {dimension_semantics = [#tpu.dimension_semantics<parallel>], iteration_bounds = array<i64: 1>, scalar_prefetch = 0 : i64, scratch_operands = 0 : i64, tpu.core_type = #tpu.core_type<tc>, window_params = [{transform_indices = @transform_0, window_bounds = array<i64: 8, 16>}, {pipeline_mode = #tpu.pipeline_mode<synchronous>, transform_indices = @transform_1, window_bounds = array<i64: 16, 128>}, {pipeline_mode = #tpu.pipeline_mode<synchronous>, transform_indices = @transform_2, window_bounds = array<i64: 1, 128>}, {pipeline_mode = #tpu.pipeline_mode<synchronous>, transform_indices = @transform_3, window_bounds = array<i64: 128, 128>}, {pipeline_mode = #tpu.pipeline_mode<synchronous>, transform_indices = @transform_4, window_bounds = array<i64: 1, 128>}, {pipeline_mode = #tpu.pipeline_mode<synchronous>, transform_indices = @transform_5, window_bounds = array<i64: 128, 128>}, {pipeline_mode = #tpu.pipeline_mode<synchronous>, transform_indices = @transform_6, window_bounds = array<i64: 1, 128>}, {pipeline_mode = #tpu.pipeline_mode<synchronous>, transform_indices = @transform_7, window_bounds = array<i64: 128, 128>}, {pipeline_mode = #tpu.pipeline_mode<synchronous>, transform_indices = @transform_8, window_bounds = array<i64: 1, 128>}, {transform_indices = @transform_9, window_bounds = array<i64: 8, 4>}]} {
    %c0 = arith.constant 0 : index
    %c0_0 = arith.constant 0 : index
    %0 = vector.load %arg1[%c0, %c0_0] : memref<8x16xbf16, #tpu.memory_space<vmem>>, vector<8x16xbf16>
    %c0_1 = arith.constant 0 : index
    %c0_2 = arith.constant 0 : index
    %1 = vector.load %arg2[%c0_1, %c0_2] : memref<16x128xbf16, #tpu.memory_space<vmem>>, vector<16x128xbf16>
    %cst = arith.constant dense<0.000000e+00> : vector<8x128xf32>
    %2 = tpu.matmul %0, %1, %cst {dimension_numbers = #tpu.dot_dimension_numbers<[1], [0], [0], [1], [0, 0, 1, 1], [], []>} : vector<8x16xbf16>, vector<16x128xbf16>, vector<8x128xf32> -> vector<8x128xf32>
    %c0_3 = arith.constant 0 : index
    %c0_4 = arith.constant 0 : index
    %3 = vector.load %arg3[%c0_3, %c0_4] : memref<1x128xf32, #tpu.memory_space<vmem>>, vector<1x128xf32>
    %4 = vector.broadcast %3 : vector<1x128xf32> to vector<8x128xf32>
    %5 = arith.addf %2, %4 : vector<8x128xf32>
    %cst_5 = arith.constant 0.000000e+00 : f32
    %6 = vector.broadcast %cst_5 : f32 to vector<8x128xf32>
    %7 = arith.maximumf %5, %6 : vector<8x128xf32>
    %8 = arith.truncf %7 : vector<8x128xf32> to vector<8x128xbf16>
    %c0_6 = arith.constant 0 : index
    %c0_7 = arith.constant 0 : index
    %9 = vector.load %arg4[%c0_6, %c0_7] : memref<128x128xbf16, #tpu.memory_space<vmem>>, vector<128x128xbf16>
    %cst_8 = arith.constant dense<0.000000e+00> : vector<8x128xf32>
    %10 = tpu.matmul %8, %9, %cst_8 {dimension_numbers = #tpu.dot_dimension_numbers<[1], [0], [0], [1], [0, 0, 1, 1], [], []>} : vector<8x128xbf16>, vector<128x128xbf16>, vector<8x128xf32> -> vector<8x128xf32>
    %c0_9 = arith.constant 0 : index
    %c0_10 = arith.constant 0 : index
    %11 = vector.load %arg5[%c0_9, %c0_10] : memref<1x128xf32, #tpu.memory_space<vmem>>, vector<1x128xf32>
    %12 = vector.broadcast %11 : vector<1x128xf32> to vector<8x128xf32>
    %13 = arith.addf %10, %12 : vector<8x128xf32>
    %cst_11 = arith.constant 0.000000e+00 : f32
    %14 = vector.broadcast %cst_11 : f32 to vector<8x128xf32>
    %15 = arith.maximumf %13, %14 : vector<8x128xf32>
    %16 = arith.truncf %15 : vector<8x128xf32> to vector<8x128xbf16>
    %c0_12 = arith.constant 0 : index
    %c0_13 = arith.constant 0 : index
    %17 = vector.load %arg6[%c0_12, %c0_13] : memref<128x128xbf16, #tpu.memory_space<vmem>>, vector<128x128xbf16>
    %cst_14 = arith.constant dense<0.000000e+00> : vector<8x128xf32>
    %18 = tpu.matmul %16, %17, %cst_14 {dimension_numbers = #tpu.dot_dimension_numbers<[1], [0], [0], [1], [0, 0, 1, 1], [], []>} : vector<8x128xbf16>, vector<128x128xbf16>, vector<8x128xf32> -> vector<8x128xf32>
    %c0_15 = arith.constant 0 : index
    %c0_16 = arith.constant 0 : index
    %19 = vector.load %arg7[%c0_15, %c0_16] : memref<1x128xf32, #tpu.memory_space<vmem>>, vector<1x128xf32>
    %20 = vector.broadcast %19 : vector<1x128xf32> to vector<8x128xf32>
    %21 = arith.addf %18, %20 : vector<8x128xf32>
    %cst_17 = arith.constant 0.000000e+00 : f32
    %22 = vector.broadcast %cst_17 : f32 to vector<8x128xf32>
    %23 = arith.maximumf %21, %22 : vector<8x128xf32>
    %24 = arith.truncf %23 : vector<8x128xf32> to vector<8x128xbf16>
    %c0_18 = arith.constant 0 : index
    %c0_19 = arith.constant 0 : index
    %25 = vector.load %arg8[%c0_18, %c0_19] : memref<128x128xbf16, #tpu.memory_space<vmem>>, vector<128x128xbf16>
    %cst_20 = arith.constant dense<0.000000e+00> : vector<8x128xf32>
    %26 = tpu.matmul %24, %25, %cst_20 {dimension_numbers = #tpu.dot_dimension_numbers<[1], [0], [0], [1], [0, 0, 1, 1], [], []>} : vector<8x128xbf16>, vector<128x128xbf16>, vector<8x128xf32> -> vector<8x128xf32>
    %c0_21 = arith.constant 0 : index
    %c0_22 = arith.constant 0 : index
    %27 = vector.load %arg9[%c0_21, %c0_22] : memref<1x128xf32, #tpu.memory_space<vmem>>, vector<1x128xf32>
    %28 = vector.broadcast %27 : vector<1x128xf32> to vector<8x128xf32>
    %29 = arith.addf %26, %28 : vector<8x128xf32>
    %cst_23 = arith.constant dense<0xFF800000> : vector<8xf32>
    %30 = vector.multi_reduction <maximumf>, %29, %cst_23 [1] : vector<8x128xf32> to vector<8xf32>
    %31 = vector.shape_cast %30 : vector<8xf32> to vector<8x1xf32>
    %32 = vector.broadcast %31 : vector<8x1xf32> to vector<8x128xf32>
    %33 = arith.subf %29, %32 : vector<8x128xf32>
    %34 = math.exp %33 : vector<8x128xf32>
    %cst_24 = arith.constant dense<0.000000e+00> : vector<8xf32>
    %35 = vector.multi_reduction <add>, %34, %cst_24 [1] : vector<8x128xf32> to vector<8xf32>
    %36 = vector.shape_cast %35 : vector<8xf32> to vector<8x1xf32>
    %37 = vector.broadcast %36 : vector<8x1xf32> to vector<8x128xf32>
    %38 = arith.divf %34, %37 : vector<8x128xf32>
    %39 = vector.extract_strided_slice %38 {offsets = [0, 0], sizes = [8, 4], strides = [1, 1]} : vector<8x128xf32> to vector<8x4xf32>
    %c0_25 = arith.constant 0 : index
    %c0_26 = arith.constant 0 : index
    %40 = vector.load %arg10[%c0_25, %c0_26] : memref<8x4xf32, #tpu.memory_space<vmem>>, vector<8x4xf32>
    tpu.vector_store %arg10[%c0_25, %c0_26], %39 {strides = array<i32>} : memref<8x4xf32, #tpu.memory_space<vmem>>, vector<8x4xf32>,
    return
  }
  func.func @transform_0(%arg0: i32) -> (i32, i32) {
    %c0_i32 = arith.constant 0 : i32
    %c0_i32_0 = arith.constant 0 : i32
    return %arg0, %c0_i32 : i32, i32
  }
  func.func @transform_1(%arg0: i32) -> (i32, i32) {
    %c0_i32 = arith.constant 0 : i32
    %c0_i32_0 = arith.constant 0 : i32
    %c0_i32_1 = arith.constant 0 : i32
    return %c0_i32, %c0_i32_0 : i32, i32
  }
  func.func @transform_2(%arg0: i32) -> (i32, i32) {
    %c0_i32 = arith.constant 0 : i32
    %c0_i32_0 = arith.constant 0 : i32
    %c0_i32_1 = arith.constant 0 : i32
    return %c0_i32, %c0_i32_0 : i32, i32
  }
  func.func @transform_3(%arg0: i32) -> (i32, i32) {
    %c0_i32 = arith.constant 0 : i32
    %c0_i32_0 = arith.constant 0 : i32
    %c0_i32_1 = arith.constant 0 : i32
    return %c0_i32, %c0_i32_0 : i32, i32
  }
  func.func @transform_4(%arg0: i32) -> (i32, i32) {
    %c0_i32 = arith.constant 0 : i32
    %c0_i32_0 = arith.constant 0 : i32
    %c0_i32_1 = arith.constant 0 : i32
    return %c0_i32, %c0_i32_0 : i32, i32
  }
  func.func @transform_5(%arg0: i32) -> (i32, i32) {
    %c0_i32 = arith.constant 0 : i32
    %c0_i32_0 = arith.constant 0 : i32
    %c0_i32_1 = arith.constant 0 : i32
    return %c0_i32, %c0_i32_0 : i32, i32
  }
  func.func @transform_6(%arg0: i32) -> (i32, i32) {
    %c0_i32 = arith.constant 0 : i32
    %c0_i32_0 = arith.constant 0 : i32
    %c0_i32_1 = arith.constant 0 : i32
    return %c0_i32, %c0_i32_0 : i32, i32
  }
  func.func @transform_7(%arg0: i32) -> (i32, i32) {
    %c0_i32 = arith.constant 0 : i32
    %c0_i32_0 = arith.constant 0 : i32
    %c0_i32_1 = arith.constant 0 : i32
    return %c0_i32, %c0_i32_0 : i32, i32
  }
  func.func @transform_8(%arg0: i32) -> (i32, i32) {
    %c0_i32 = arith.constant 0 : i32
    %c0_i32_0 = arith.constant 0 : i32
    %c0_i32_1 = arith.constant 0 : i32
    return %c0_i32, %c0_i32_0 : i32, i32
  }
  func.func @transform_9(%arg0: i32) -> (i32, i32) {
    %c0_i32 = arith.constant 0 : i32
    %c0_i32_0 = arith.constant 0 : i32
    return %arg0, %c0_i32 : i32, i32
  }
}

</mosaic_0001>

<bundles_post_ra>
// kernel: tpu_custom_call.1
= control target key start
LH: loop header
LB: loop body
LE: loop exit
PB: predicated region body
PF: predicated region fallthrough
CT: control target
= control target key end

     0   :  { %14 = vsyncpa [#allocation3], 0  ;;  %s773_s0 = inlined_call_operand.hbm [shape: bf16[8,16], index: 0, kind: input, shape index: {}]   ;;  %s774_s1 = inlined_call_operand.hbm [shape: bf16[16,128], index: 1, kind: input, shape index: {}]   ;;  %s775_s2 = inlined_call_operand.vmem [shape: f32[1,128], index: 2, kind: input, shape index: {}]   ;;  %s776_s3 = inlined_call_operand.hbm [shape: bf16[128,128], index: 3, kind: input, shape index: {}]   ;;  %s777_s4 = inlined_call_operand.vmem [shape: f32[1,128], index: 4, kind: input, shape index: {}]   ;;  %s778_s5 = inlined_call_operand.hbm [shape: bf16[128,128], index: 5, kind: input, shape index: {}]   ;;  %s779_s6 = inlined_call_operand.vmem [shape: f32[1,128], index: 6, kind: input, shape index: {}]   ;;  %s780_s7 = inlined_call_operand.hbm [shape: bf16[128,128], index: 7, kind: input, shape index: {}]   ;;  %s781_s8 = inlined_call_operand.vmem [shape: f32[1,128], index: 8, kind: input, shape index: {}]   ;;  %s782_s9 = inlined_call_operand.vmem [shape: f32[8,4], index: 9, kind: output, shape index: {}]  }
   0x1   :  { %15 = vsyncpa [#allocation5], 0  ;;  %s32_s11 = sshll.u32 %s774_s1, 4  ;;  %s33_s11 = int_to_ptr.hbm [resolvable:$true] %s32_s11 }
   0x2   :  { %16 = vsyncpa [#allocation8], 0  ;;  %s686_s12 = smov [#allocation4]   ;;  %s62_s16 = sshll.u32 %s778_s5, 4  ;;  %s63_s16 = int_to_ptr.hbm [resolvable:$true] %s62_s16 }
   0x3   :  { %s34_s13 = sshll.u32 %s686_s12, 4  ;;  %s687_s17 = smov 64   ;;  %s35_s13 = int_to_ptr.vmem [resolvable:$true] %s34_s13 }
   0x4   :  { %s688_s18 = smov 4   ;;  %s689_s19 = smov [#allocation7]  }
   0x5   :  { %40 = dma.hbm_to_vmem [thread:$0]  %s33_s11, 128, %s35_s13, [#allocation5], %s687_s17, %s687_s17, %s688_s18  }
   0x6   :  { %s64_s20 = sshll.u32 %s689_s19, 4  ;;  %s22_s23 = sshll.u32 %s773_s0, 4  ;;  %s65_s20 = int_to_ptr.vmem [resolvable:$true] %s64_s20  ;;  %s23_s23 = int_to_ptr.hbm [resolvable:$true] %s22_s23 }
   0x7   :  { %70 = dma.hbm_to_vmem [thread:$0]  %s63_s16, 1024, %s65_s20, [#allocation8], %s687_s17, %s687_s17, %s688_s18  }
   0x8   :  { %s47_s25 = sshll.u32 %s776_s3, 4  ;;  %s690_s26 = smov [#allocation2]   ;;  %s48_s25 = int_to_ptr.hbm [resolvable:$true] %s47_s25 }
   0x9   :  { %s24_s27 = sshll.u32 %s690_s26, 4  ;;  %s691_s5 = smov [#allocation6]   ;;  %s25_s27 = int_to_ptr.vmem [resolvable:$true] %s24_s27 }
   0xa   :  { %27 = dma.hbm_to_vmem [thread:$0]  %s23_s23, 64, %s25_s27, [#allocation3]  }
   0xb   :  { %s49_s28 = sshll.u32 %s691_s5, 4  ;;  %s77_s10 = sshll.u32 %s780_s7, 4  ;;  %s50_s28 = int_to_ptr.vmem [resolvable:$true] %s49_s28  ;;  %s78_s10 = int_to_ptr.hbm [resolvable:$true] %s77_s10 }
   0xc   :  { %55 = dma.hbm_to_vmem [thread:$0]  %s48_s25, 1024, %s50_s28, [#allocation5], %s687_s17, %s687_s17, %s688_s18  }
   0xd   :  { %s692_s0 = smov [#allocation9]  }
   0xe   :  { %s79_s11 = sshll.u32 %s692_s0, 4  ;;  %s80_s11 = int_to_ptr.vmem [resolvable:$true] %s79_s11 }
   0xf   :  { %85 = dma.hbm_to_vmem [thread:$0]  %s78_s10, 1024, %s80_s11, [#allocation8], %s687_s17, %s687_s17, %s688_s18  }
  0x10   :  { %680 = dma.done.wait [#allocation3], 64  }
  0x11   :  { %681 = vsyncadd [#allocation3], 4294967232 }
  0x12   :  { %682 = dma.done.wait [#allocation5], 1152  }
  0x13   :  { %683 = vsyncadd [#allocation5], 4294966144 }
  0x14   :  { %684 = dma.done.wait [#allocation8], 2048  }
  0x15   :  { %685 = vsyncadd [#allocation8], 4294965248  ;;  %v520_v0 = vld [vmem:[#allocation4] sm:$0xff]  ;;  %v109_v2 = vld [vmem:[#allocation2] sm:$0xf]  ;;  %vm122_vm0 = vcmask 130048  }
  0x16   :  { %v528_v1 = vld [vmem:[#allocation6 + $0x38] sm:$0xff]  ;;  %133 = vmatpush.bf16.msra.mxu0 %v520_v0  ;;  %v527_v3 = vld [vmem:[#allocation6 + $0x30] sm:$0xff]  ;;  %v526_v4 = vld [vmem:[#allocation6 + $0x28] sm:$0xff]  ;;  %vm410_vm5 = vcmask 31744  }
  0x17   :  { %209 = vmatpush.bf16.msra.mxu1 %v528_v1  ;;  %v525_v5 = vld [vmem:[#allocation6 + $0x20] sm:$0xff]  ;;  %v524_v6 = vld [vmem:[#allocation6 + $0x18] sm:$0xff]  ;;  %v523_v7 = vld [vmem:[#allocation6 + $0x10] sm:$0xff] }
  0x18   :  { %v522_v8 = vld [vmem:[#allocation6 + $0x8] sm:$0xff]  ;;  %v521_v9 = vld [vmem:[#allocation6] sm:$0xff]  ;;  %v536_v10 = vld [vmem:[#allocation7 + $0x38] sm:$0xff] }
  0x19   :  { %423 = vmatmul.msk.bf16.vlgmr.msra.gmra.mxu0 %vm122_vm0, %v109_v2  ;;  %292 = vmatpush.bf16.msra.mxu2 %v536_v10  ;;  %v535_v11 = vld [vmem:[#allocation7 + $0x30] sm:$0xff]  ;;  %v534_v12 = vld [vmem:[#allocation7 + $0x28] sm:$0xff]  ;;  %v533_v13 = vld [vmem:[#allocation7 + $0x20] sm:$0xff] }
  0x1a   :  { %v532_v14 = vld [vmem:[#allocation7 + $0x18] sm:$0xff]  ;;  %v531_v15 = vld [vmem:[#allocation7 + $0x10] sm:$0xff]  ;;  %v530_v22 = vld [vmem:[#allocation7 + $0x8] sm:$0xff] }
  0x1b   :  { %210 = vmatpush.bf16.msra.mxu1 %v527_v3  ;;  %v552_v16 = vld [vmem:[%s775_s2] ss:$0 sm:$0xff]  ;;  %v529_v23 = vld [vmem:[#allocation7] sm:$0xff]  ;;  %v544_v24 = vld [vmem:[#allocation9 + $0x38] sm:$0xff] }
  0x1c   :  { %375 = vmatpush.bf16.msra.mxu3 %v544_v24  ;;  %v543_v25 = vld [vmem:[#allocation9 + $0x30] sm:$0xff]  ;;  %v542_v26 = vld [vmem:[#allocation9 + $0x28] sm:$0xff]  ;;  %v541_v27 = vld [vmem:[#allocation9 + $0x20] sm:$0xff] }
  0x1d   :  { %293 = vmatpush.bf16.msra.mxu2 %v535_v11  ;;  %v540_v28 = vld [vmem:[#allocation9 + $0x18] sm:$0xff]  ;;  %v539_v29 = vld [vmem:[#allocation9 + $0x10] sm:$0xff]  ;;  %v538_v36 = vld [vmem:[#allocation9 + $0x8] sm:$0xff] }
  0x1e   :  { %v553_v30 = vld [vmem:[%s777_s4] ss:$0 sm:$0xff]  ;;  %v537_v37 = vld [vmem:[#allocation9] sm:$0xff] }
  0x1f   :  { %211 = vmatpush.bf16.msra.mxu1 %v526_v4  ;;  %v554_v38 = vld [vmem:[%s779_s6] ss:$0 sm:$0xff] }
  0x20   :  { %376 = vmatpush.bf16.msra.mxu3 %v543_v25  ;;  %v555_v44 = vld [vmem:[%s781_s8] ss:$0 sm:$0xff] }
  0x21   :  { %294 = vmatpush.bf16.msra.mxu2 %v534_v12 }
  0x23   :  { %212 = vmatpush.bf16.msra.mxu1 %v525_v5 }
  0x24   :  { %377 = vmatpush.bf16.msra.mxu3 %v542_v26 }
  0x25   :  { %295 = vmatpush.bf16.msra.mxu2 %v533_v13 }
  0x27   :  { %213 = vmatpush.bf16.msra.mxu1 %v524_v6 }
  0x28   :  { %378 = vmatpush.bf16.msra.mxu3 %v541_v27 }
  0x29   :  { %296 = vmatpush.bf16.msra.mxu2 %v532_v14 }
  0x2b   :  { %214 = vmatpush.bf16.msra.mxu1 %v523_v7 }
  0x2c   :  { %379 = vmatpush.bf16.msra.mxu3 %v540_v28 }
  0x2d   :  { %297 = vmatpush.bf16.msra.mxu2 %v531_v15 }
  0x2f   :  { %215 = vmatpush.bf16.msra.mxu1 %v522_v8 }
  0x30   :  { %380 = vmatpush.bf16.msra.mxu3 %v539_v29 }
  0x31   :  { %298 = vmatpush.bf16.msra.mxu2 %v530_v22 }
  0x33   :  { %216 = vmatpush.bf16.msra.mxu1 %v521_v9 }
  0x34   :  { %381 = vmatpush.bf16.msra.mxu3 %v538_v36 }
  0x35   :  { %299 = vmatpush.bf16.msra.mxu2 %v529_v23 }
  0x38   :  { %382 = vmatpush.bf16.msra.mxu3 %v537_v37 }
  0x96   :  { %v135_v17 = vpop.f32.mrf.mxu0 }
  0x97   :  { %v136_v18 = vadd.f32 %v552_v16, %v135_v17 }
  0x99   :  { %v139_v19 = vmax.f32 %v136_v18, 0.0 }
  0x9b   :  { %v140_v20 = vpack.c.bf16 %v139_v19, %v139_v19 }
  0x9d   :  { %217 = vmatmul.bf16.vlgmr.msra.gmra.mxu1 %v140_v20 }
  0x9e   :  { %v137_v21 = vpop.f32.mrf.mxu0 }
 0x11a   :  { %v218_v31 = vpop.f32.mrf.mxu1 }
 0x11b   :  { %v219_v32 = vadd.f32 %v553_v30, %v218_v31 }
 0x11d   :  { %v222_v33 = vmax.f32 %v219_v32, 0.0 }
 0x11f   :  { %v223_v34 = vpack.c.bf16 %v222_v33, %v222_v33 }
 0x121   :  { %300 = vmatmul.bf16.vlgmr.msra.gmra.mxu2 %v223_v34 }
 0x122   :  { %v220_v35 = vpop.f32.mrf.mxu1 }
 0x1a4   :  { %v301_v39 = vpop.f32.mrf.mxu2 }
 0x1a5   :  { %v302_v40 = vadd.f32 %v554_v38, %v301_v39 }
 0x1a7   :  { %v305_v41 = vmax.f32 %v302_v40, 0.0 }
 0x1a9   :  { %v306_v42 = vpack.c.bf16 %v305_v41, %v305_v41 }
 0x1ab   :  { %383 = vmatmul.bf16.vlgmr.msra.gmra.mxu3 %v306_v42 }
 0x1ac   :  { %v303_v43 = vpop.f32.mrf.mxu2 }
 0x22e   :  { %v384_v45 = vpop.f32.mrf.mxu3 }
 0x22f   :  { %v385_v46 = vadd.f32 %v555_v44, %v384_v45 }
 0x231   :  { %388 = vmax.xlane.f32.xlu0 %v385_v46 }
 0x236   :  { %v386_v47 = vpop.f32.mrf.mxu3 }
 0x2a4   :  { %v389_v48 = vpop.xlane.xlu0 %388 }
 0x2a5   :  { %v390_v49 = vsub.f32 %v385_v46, %v389_v48 }
 0x2a7   :  { %v391_v50 = vmul.f32 1.442695, %v390_v49 }
 0x2a9   :  { %556 = vpow2.f32 %v391_v50 }
 0x2af   :  { %v557_v51 = vpop.eup %556 }
 0x2b0   :  { %393 = vadd.xlane.f32.xlu0 %v557_v51 }
 0x323   :  { %v394_v52 = vpop.xlane.xlu0 %393 }
 0x324   :  { %558 = vrcp.f32 %v394_v52  ;;  %v406_v56 = vand.u32 2147483648, %v394_v52  ;;  %v404_v58 = vand.u32 2147483647, %v394_v52  ;;  %vm400_vm2 = vweird.f32 %v394_v52 }
 0x326   :  { %v407_v60 = vor.u32 1.1754944e-38, %v406_v56  ;;  %vm405_vm4 = vcmp.eq.f32.partialorder %v404_v58, 8.507059e+37 }
 0x32a   :  { %v559_v53 = vpop.eup %558 }
 0x32b   :  { %v396_v54 = vmul.f32 %v559_v53, %v394_v52  ;;  %vm401_vm1 = vweird.f32 %v559_v53 }
 0x32c   :  { %vm402_vm3 = vmor %vm400_vm2, %vm401_vm1 }
 0x32d   :  { %v397_v55 = vsub.f32 1.0, %v396_v54 }
 0x32f   :  { %v398_v57 = vmul.f32 %v559_v53, %v397_v55 }
 0x331   :  { %v399_v59 = vadd.f32 %v559_v53, %v398_v57 }
 0x333   :  { %v403_v61 = vsel %vm402_vm3, %v559_v53, %v399_v59 }
 0x334   :  { %v408_v62 = vsel %vm405_vm4, %v407_v60, %v403_v61 }
 0x335   :  { %v409_v63 = vmul.f32 %v557_v51, %v408_v62 }
 0x337   :  { %411 = vst.msk [vmem:[%s782_s9] sm:$0xff] %vm410_vm5, %v409_v63 }
 0x338   :  { %416 = vsyncpa [#allocation3], 1 }
 0x339   :  { %417 = vsyncpa [#allocation5], 1 }
 0x33a   :  { %418 = vsyncpa [#allocation8], 1 }

</bundles_post_ra>
